<compile_context>
chip_gen: v5e
topology: v5e:2x2
jax: 0.10.0
libtpu: 0.0.40
codegen_flags: <defaults>
</compile_context>

<pallas_src>
import jax
import jax.numpy as jnp
from jax.experimental import pallas as pl
from jax.experimental.pallas import tpu as pltpu

DROP_P = 0.5


def _attn_kernel(x_ref, wqkv_ref, drop_ref, out_ref):
    x = x_ref[...].astype(jnp.float32)

    # Fused q/k/v projection: one MXU issue.  wqkv = [Wq^T * 1/sqrt(d_k) | Wk^T | Wv^T].
    qkv = jnp.dot(x, wqkv_ref[...].astype(jnp.float32),
                  preferred_element_type=jnp.float32)
    d_out = qkv.shape[1] // 3
    q = qkv[:, :d_out]
    k = qkv[:, d_out:2 * d_out]
    v = qkv[:, 2 * d_out:]

    # scores = q @ k^T  (contract last dims of both operands; no explicit transpose of k)
    scores = jax.lax.dot_general(
        q, k, dimension_numbers=(((1,), (1,)), ((), ())),
        preferred_element_type=jnp.float32)

    # Causal mask: strictly-upper-triangular entries -> -inf.
    # NOTE: the 1/sqrt(d_k) scale is already folded into Wq on the host (equivalent numerics).
    T = scores.shape[0]
    row = jax.lax.broadcasted_iota(jnp.int32, (T, T), 0)
    col = jax.lax.broadcasted_iota(jnp.int32, (T, T), 1)
    masked = jnp.where(col > row, -jnp.inf, scores)

    # Softmax over dim=1; the dropout keep-mask (pre-scaled by 1/(1-p)) is fused into the
    # same broadcast multiply as the per-row normalization.
    m = jnp.max(masked, axis=1, keepdims=True)
    e = jnp.exp(masked - m)
    inv = 1.0 / jnp.sum(e, axis=1, keepdims=True)
    attn = e * inv * drop_ref[...]          # drop_ref entries are 0.0 or 1/(1-p)

    # context = attn_weights @ values
    ctx = jnp.dot(attn, v, preferred_element_type=jnp.float32)
    out_ref[...] = ctx.astype(out_ref.dtype)


def self_attention_v2(x, w_query, w_key, w_value, drop_key):
    """x: (T, d_in) f32.  w_*: (d_out, d_in) f32 (PyTorch nn.Linear layout, bias=False).
    drop_key: jax PRNG key for the dropout mask.  Returns context (T, d_out) f32."""
    T, d_in = x.shape
    d_out = w_query.shape[0]

    # Host-side prep: fold attention scale into Wq, concatenate transposed weights into
    # a single (d_in, 3*d_out) matrix so the kernel does one projection matmul.
    scale = 1.0 / (d_out ** 0.5)
    w_qkv = jnp.concatenate(
        [w_query.T * scale, w_key.T, w_value.T], axis=1).astype(jnp.float32)

    # Training-mode inverted dropout mask, pre-scaled by 1/(1-p).
    # (Uses JAX's RNG, not torch's RNG stream; dropout semantics are identical.)
    keep = jax.random.bernoulli(drop_key, 1.0 - DROP_P, (T, T))
    drop_mask = keep.astype(jnp.float32) * (1.0 / (1.0 - DROP_P))

    vmem = pltpu.MemorySpace.VMEM
    return pl.pallas_call(
        _attn_kernel,
        out_shape=jax.ShapeDtypeStruct((T, d_out), x.dtype),
        in_specs=[
            pl.BlockSpec(memory_space=vmem),   # x
            pl.BlockSpec(memory_space=vmem),   # fused [Wq^T*s | Wk^T | Wv^T]
            pl.BlockSpec(memory_space=vmem),   # dropout mask (pre-scaled)
        ],
        out_specs=pl.BlockSpec(memory_space=vmem),
    )(x, w_qkv, drop_mask)


if __name__ == "__main__":
    # Exact token embeddings from the module spec: (6, 3), d_out = 2.
    inputs = jnp.array([[0.43, 0.15, 0.89],
                        [0.55, 0.87, 0.66],
                        [0.57, 0.85, 0.64],
                        [0.22, 0.58, 0.33],
                        [0.77, 0.25, 0.10],
                        [0.05, 0.80, 0.55]], dtype=jnp.float32)
    T, d_in = inputs.shape
    d_out = 2

    key = jax.random.PRNGKey(0)
    kq, kk, kv, kdrop = jax.random.split(key, 4)

    # nn.Linear(d_in, d_out, bias=False) weights in PyTorch layout (d_out, d_in),
    # init uniform(-1/sqrt(d_in), 1/sqrt(d_in)).
    bound = 1.0 / (d_in ** 0.5)
    w_query = jax.random.uniform(kq, (d_out, d_in), minval=-bound, maxval=bound, dtype=jnp.float32)
    w_key = jax.random.uniform(kk, (d_out, d_in), minval=-bound, maxval=bound, dtype=jnp.float32)
    w_value = jax.random.uniform(kv, (d_out, d_in), minval=-bound, maxval=bound, dtype=jnp.float32)

    out = self_attention_v2(inputs, w_query, w_key, w_value, kdrop)
    jax.block_until_ready(out)

    assert out.shape == (T, d_out)
    assert bool(jnp.all(jnp.isfinite(out)))
    print("KERNEL_OK")
</pallas_src>

<mosaic_0001>
module attributes {stable_mosaic.version = 11 : i64} {
  func.func @_attn_kernel(%arg0: memref<6x3xf32, #tpu.memory_space<vmem>>, %arg1: memref<3x6xf32, #tpu.memory_space<vmem>>, %arg2: memref<6x6xf32, #tpu.memory_space<vmem>>, %arg3: memref<6x2xf32, #tpu.memory_space<vmem>>) attributes {dimension_semantics = [], scalar_prefetch = 0 : i64, scratch_operands = 0 : i64, tpu.core_type = #tpu.core_type<tc>} {
    %c0 = arith.constant 0 : index
    %c0_0 = arith.constant 0 : index
    %0 = vector.load %arg0[%c0, %c0_0] : memref<6x3xf32, #tpu.memory_space<vmem>>, vector<6x3xf32>
    %c0_1 = arith.constant 0 : index
    %c0_2 = arith.constant 0 : index
    %1 = vector.load %arg1[%c0_1, %c0_2] : memref<3x6xf32, #tpu.memory_space<vmem>>, vector<3x6xf32>
    %cst = arith.constant dense<0.000000e+00> : vector<6x6xf32>
    %2 = tpu.matmul %0, %1, %cst {dimension_numbers = #tpu.dot_dimension_numbers<[1], [0], [0], [1], [0, 0, 1, 1], [], []>} : vector<6x3xf32>, vector<3x6xf32>, vector<6x6xf32> -> vector<6x6xf32>
    %3 = vector.extract_strided_slice %2 {offsets = [0, 0], sizes = [6, 2], strides = [1, 1]} : vector<6x6xf32> to vector<6x2xf32>
    %4 = vector.extract_strided_slice %2 {offsets = [0, 2], sizes = [6, 2], strides = [1, 1]} : vector<6x6xf32> to vector<6x2xf32>
    %5 = vector.extract_strided_slice %2 {offsets = [0, 4], sizes = [6, 2], strides = [1, 1]} : vector<6x6xf32> to vector<6x2xf32>
    %cst_3 = arith.constant dense<0.000000e+00> : vector<6x6xf32>
    %6 = tpu.matmul %3, %4, %cst_3 {dimension_numbers = #tpu.dot_dimension_numbers<[1], [1], [0], [0], [0, 0, 1, 0], [], []>} : vector<6x2xf32>, vector<6x2xf32>, vector<6x6xf32> -> vector<6x6xf32>
    %7 = tpu.iota {dimensions = array<i32: 0>} : vector<6x6xi32>
    %8 = tpu.iota {dimensions = array<i32: 1>} : vector<6x6xi32>
    %9 = arith.cmpi sgt, %8, %7 : vector<6x6xi32>
    %cst_4 = arith.constant 0xFF800000 : f32
    %10 = vector.broadcast %cst_4 : f32 to vector<6x6xf32>
    %11 = arith.select %9, %10, %6 : vector<6x6xi1>, vector<6x6xf32>
    %cst_5 = arith.constant dense<0xFF800000> : vector<6xf32>
    %12 = vector.multi_reduction <maximumf>, %11, %cst_5 [1] : vector<6x6xf32> to vector<6xf32>
    %13 = vector.shape_cast %12 : vector<6xf32> to vector<6x1xf32>
    %14 = vector.broadcast %13 : vector<6x1xf32> to vector<6x6xf32>
    %15 = arith.subf %11, %14 : vector<6x6xf32>
    %16 = math.exp %15 : vector<6x6xf32>
    %cst_6 = arith.constant dense<0.000000e+00> : vector<6xf32>
    %17 = vector.multi_reduction <add>, %16, %cst_6 [1] : vector<6x6xf32> to vector<6xf32>
    %18 = vector.shape_cast %17 : vector<6xf32> to vector<6x1xf32>
    %cst_7 = arith.constant 1.000000e+00 : f32
    %19 = vector.broadcast %cst_7 : f32 to vector<6x1xf32>
    %20 = arith.divf %19, %18 : vector<6x1xf32>
    %21 = vector.broadcast %20 : vector<6x1xf32> to vector<6x6xf32>
    %22 = arith.mulf %16, %21 : vector<6x6xf32>
    %c0_8 = arith.constant 0 : index
    %c0_9 = arith.constant 0 : index
    %23 = vector.load %arg2[%c0_8, %c0_9] : memref<6x6xf32, #tpu.memory_space<vmem>>, vector<6x6xf32>
    %24 = arith.mulf %22, %23 : vector<6x6xf32>
    %cst_10 = arith.constant dense<0.000000e+00> : vector<6x2xf32>
    %25 = tpu.matmul %24, %5, %cst_10 {dimension_numbers = #tpu.dot_dimension_numbers<[1], [0], [0], [1], [0, 0, 1, 1], [], []>} : vector<6x6xf32>, vector<6x2xf32>, vector<6x2xf32> -> vector<6x2xf32>
    %c0_11 = arith.constant 0 : index
    %c0_12 = arith.constant 0 : index
    %26 = vector.load %arg3[%c0_11, %c0_12] : memref<6x2xf32, #tpu.memory_space<vmem>>, vector<6x2xf32>
    tpu.vector_store %arg3[%c0_11, %c0_12], %25 {strides = array<i32>} : memref<6x2xf32, #tpu.memory_space<vmem>>, vector<6x2xf32>,
    return
  }
}

</mosaic_0001>

<bundles_post_ra>
// kernel: tpu_custom_call.1
= control target key start
LH: loop header
LB: loop body
LE: loop exit
PB: predicated region body
PF: predicated region fallthrough
CT: control target
= control target key end

     0   :  { %vm20_vm0 = vcmask 1042432   ;;  %vm16_vm1 = vcmask 23552   ;;  %s153_s16 = smov 126   ;;  %vm47_vm2 = vcmask 15360   ;;  %v72_v4 = vlaneseq  ;;  %s187_s1 = inlined_call_operand.vmem [shape: f32[3,6], index: 1, kind: input, shape index: {}]   ;;  %s188_s0 = inlined_call_operand.vmem [shape: f32[6,3], index: 0, kind: input, shape index: {}]   ;;  %s189_s2 = inlined_call_operand.vmem [shape: f32[6,6], index: 2, kind: input, shape index: {}]   ;;  %s190_s3 = inlined_call_operand.vmem [shape: f32[6,2], index: 3, kind: output, shape index: {}]  }
   0x1   :  { %v15_v0 = vld [vmem:[%s187_s1] sm:$0x7]  ;;  %vm78_vm4 = vcmask 46080   ;;  %vm112_vm9 = vcmask 1045504   ;;  %vm108_vm10 = vcmask 48128   ;;  %vm135_vm11 = vcmask 13312  }
   0x2   :  { %v14_v1 = vld [vmem:[%s188_s0] sm:$0x3f]  ;;  %141 = vmatpush.msk.msra.mxu0 %vm20_vm0, %v15_v0  ;;  %v73_v5 = vshrl.u32 %v72_v4, 7  ;;  %v75_v6 = vand.u32 127, %v72_v4  ;;  %s154_s0 = smov 124  }
   0x3   :  { %142 = vmatmul.msk.f32.vlgmr.msra.gmra.mxu0 %vm16_vm1, %v14_v1  ;;  %v104_v27 = vld [vmem:[%s189_s2] sm:$0x3f] }
   0x4   :  { %vm76_vm3 = vcmp.gt.s32.totalorder %v75_v6, %v73_v5 }
  0x80   :  { %v41_v2 = vpop.f32.mrf.mxu0 }
  0x81   :  { %45 = vrot.lane.b32.xlu0 %v41_v2, %s153_s16 }
  0xf3   :  { %v46_v3 = vpop.permute.xlu0 %45 }
  0xf4   :  { %143 = vmatpush.xpose.msk.msra.mxu1 %vm47_vm2, %v46_v3 }
  0xf7   :  { %144 = vmatmul.msk.f32.vlgmr.msra.gmra.mxu1 %vm47_vm2, %v41_v2 }
 0x174   :  { %v69_v7 = vpop.f32.mrf.mxu1 }
 0x175   :  { %v77_v8 = vsel %vm76_vm3, -inf, %v69_v7 }
 0x176   :  { %v79_v9 = vsel %vm78_vm4, %v77_v8, -inf }
 0x177   :  { %80 = vmax.xlane.f32.xlu0 %v79_v9 }
 0x1ea   :  { %v81_v10 = vpop.xlane.xlu0 %80 }
 0x1eb   :  { %v82_v11 = vsub.f32 %v77_v8, %v81_v10 }
 0x1ed   :  { %v83_v12 = vmul.f32 1.442695, %v82_v11 }
 0x1ef   :  { %149 = vpow2.f32 %v83_v12 }
 0x1f5   :  { %v150_v13 = vpop.eup %149 }
 0x1f6   :  { %v85_v14 = vsel %vm78_vm4, %v150_v13, 0.0 }
 0x1f7   :  { %86 = vadd.xlane.f32.xlu1 %v85_v14 }
 0x210   :  { %106 = vrot.lane.b32.xlu1 %v41_v2, %s154_s0 }
 0x26a   :  { %v87_v15 = vpop.xlane.xlu1 %86 }
 0x26b   :  { %151 = vrcp.f32 %v87_v15  ;;  %v99_v19 = vand.u32 2147483648, %v87_v15  ;;  %v97_v21 = vand.u32 2147483647, %v87_v15  ;;  %vm93_vm6 = vweird.f32 %v87_v15 }
 0x26d   :  { %v100_v23 = vor.u32 1.1754944e-38, %v99_v19  ;;  %vm98_vm8 = vcmp.eq.f32.partialorder %v97_v21, 8.507059e+37 }
 0x271   :  { %v152_v16 = vpop.eup %151 }
 0x272   :  { %v89_v17 = vmul.f32 %v152_v16, %v87_v15  ;;  %vm94_vm5 = vweird.f32 %v152_v16 }
 0x273   :  { %vm95_vm7 = vmor %vm93_vm6, %vm94_vm5 }
 0x274   :  { %v90_v18 = vsub.f32 1.0, %v89_v17 }
 0x276   :  { %v91_v20 = vmul.f32 %v152_v16, %v90_v18 }
 0x278   :  { %v92_v22 = vadd.f32 %v152_v16, %v91_v20 }
 0x27a   :  { %v96_v24 = vsel %vm95_vm7, %v152_v16, %v92_v22 }
 0x27b   :  { %v101_v25 = vsel %vm98_vm8, %v100_v23, %v96_v24 }
 0x27c   :  { %v103_v26 = vmul.f32 %v150_v13, %v101_v25 }
 0x27e   :  { %v105_v29 = vmul.f32 %v104_v27, %v103_v26 }
 0x282   :  { %v107_v28 = vpop.permute.xlu1 %106 }
 0x283   :  { %145 = vmatpush.msk.msra.mxu2 %vm112_vm9, %v107_v28 }
 0x284   :  { %146 = vmatmul.msk.f32.vlgmr.msra.gmra.mxu2 %vm108_vm10, %v105_v29 }
 0x307   :  { %v132_v30 = vpop.f32.mrf.mxu2 }
 0x308   :  { %136 = vst.msk [vmem:[%s190_s3] sm:$0x3f] %vm135_vm11, %v132_v30 }

</bundles_post_ra>
